<compile_context>
chip_gen: v7x
topology: tpu7x:2x2x1
jax: 0.10.0
libtpu: 0.0.40
codegen_flags: <defaults>
</compile_context>

<pallas_src>
import functools

import jax
import jax.numpy as jnp
from jax.experimental import pallas as pl
from jax.experimental.pallas import tpu as pltpu


def _masked_l1_kernel(pred_ref, tgt_ref, thresh_ref, out_ref, *, total_rows):
    """One grid step processes `tb` batch rows and emits one partial-sum tile.

    pred_ref/tgt_ref: (tb, F) flattened pose features (F = T*D).
    thresh_ref:       (tb, 1) int32, number of valid flat elements = lengths*D.
    out_ref:          (1, 8, 128) f32, this block's sum of valid per-row means,
                      broadcast across the tile (wrapper reads [i, 0, 0]).
    """
    p = pred_ref[...].astype(jnp.float32)
    t = tgt_ref[...].astype(jnp.float32)
    diff = jnp.abs(p - t)

    tb, flat = diff.shape
    thresh = thresh_ref[...]                                        # (tb, 1) i32
    lane_idx = jax.lax.broadcasted_iota(jnp.int32, (tb, flat), 1)
    masked = jnp.where(lane_idx < thresh, diff, 0.0)

    row_sums = jnp.sum(masked, axis=-1, keepdims=True)              # (tb, 1) f32
    # Rows with thresh == 0 give 0/0 -> NaN, matching torch's mean over an
    # empty slice.
    row_means = row_sums / thresh.astype(jnp.float32)               # (tb, 1)

    # Drop rows that fall outside the real batch (partial last block).  Done by
    # GLOBAL row index so genuine zero-length NaNs are preserved, while garbage
    # read from the out-of-bounds tail is excluded.
    row_idx = jax.lax.broadcasted_iota(jnp.int32, (tb, 1), 0)
    global_row = pl.program_id(0) * tb + row_idx
    contrib = jnp.where(global_row < total_rows, row_means, 0.0)

    block_sum = jnp.sum(contrib, keepdims=True)                     # (1, 1)
    out_ref[...] = jnp.broadcast_to(block_sum.reshape(1, 1, 1), out_ref.shape)


def _tile_params(B, F, itemsize):
    """Pick rows-per-grid-step (tb) and a VMEM limit, per TPU generation."""
    try:
        phys_vmem = int(getattr(pltpu.get_tpu_info(), "vmem_capacity_bytes",
                                64 << 20))
    except Exception:
        phys_vmem = 64 << 20                      # conservative (v7x-sized)
    # 128 MiB chips (v5e/v6e) -> 64 MiB scoped limit; 64 MiB chips (v7x) -> 32.
    vmem_limit = int(min(phys_vmem // 2, 64 << 20))
    # 2 inputs x 2 pipeline buffers + headroom for the (tiny) output buffers.
    block_budget = vmem_limit // 5

    if B <= 8:
        # A single full-batch block (block dim == full array dim is always a
        # legal block shape); no partial block at all.
        return max(B, 1), vmem_limit

    bytes_per_row = max(F * itemsize, 1)
    tb = block_budget // bytes_per_row
    tb = max(8, min(2048, (tb // 8) * 8))
    # Never exceed the (rounded-up) batch.
    tb = min(tb, ((B + 7) // 8) * 8)
    # Keep >= 2 grid steps so the "parallel" batch axis can shard across both
    # TensorCores on v7x (a near-free extra step on single-TC v5e/v6e).
    half = ((((B + 1) // 2) + 7) // 8) * 8
    tb = min(tb, max(8, half))
    return tb, vmem_limit


def masked_pose_l1(prediction, target, lengths, *, tb=None):
    """prediction/target: [B, T, D]; lengths: [B] int."""
    B, T, D = prediction.shape
    F = T * D

    # Clamp lengths to T: PyTorch's `prediction[i, :L]` caps the slice at T.
    lengths = jnp.clip(lengths.astype(jnp.int32), 0, T)
    thresh = (lengths * D).reshape(B, 1)          # valid flat elements per row

    pred = prediction.reshape(B, F)
    tgt = target.reshape(B, F)

    auto_tb, vmem_limit = _tile_params(B, F, pred.dtype.itemsize)
    if tb is None:
        tb = auto_tb

    num_blocks = (B + tb - 1) // tb

    # TODO(synk): for very large T*D, add a second ("arbitrary") grid axis over
    # the feature dim with a per-row scratch accumulator; typical pose feature
    # sizes fit comfortably in a single lane-dense block.
    out = pl.pallas_call(
        functools.partial(_masked_l1_kernel, total_rows=B),
        out_shape=jax.ShapeDtypeStruct((num_blocks, 8, 128), jnp.float32),
        grid_spec=pltpu.PrefetchScalarGridSpec(
            num_scalar_prefetch=0,
            grid=(num_blocks,),
            in_specs=[
                pl.BlockSpec((tb, F), lambda i: (i, 0)),
                pl.BlockSpec((tb, F), lambda i: (i, 0)),
                pl.BlockSpec((tb, 1), lambda i: (i, 0)),
            ],
            out_specs=pl.BlockSpec((1, 8, 128), lambda i: (i, 0, 0)),
        ),
        compiler_params=pltpu.CompilerParams(
            dimension_semantics=("parallel",),
            vmem_limit_bytes=vmem_limit,
        ),
    )(pred, tgt, thresh)

    # Each block's partial sum of per-row means lives at [i, 0, 0].
    return jnp.sum(out[:, 0, 0]) / B


def _reference(prediction, target, lengths):
    # Pure-JAX reference reproducing the PyTorch loop.
    B = prediction.shape[0]
    loss = 0.0
    for i in range(B):
        L = int(lengths[i])
        p = prediction[i, :L].astype(jnp.float32)
        t = target[i, :L].astype(jnp.float32)
        loss = loss + jnp.mean(jnp.abs(p - t))
    return loss / B


if __name__ == "__main__":
    key = jax.random.PRNGKey(0)
    k1, k2, k3, k4 = jax.random.split(key, 4)

    # Case 1: small shapes typical of the module's usage.
    B, T, D = 2, 8, 32
    prediction = jax.random.normal(k1, (B, T, D), dtype=jnp.float32)
    target = jax.random.normal(k2, (B, T, D), dtype=jnp.float32)
    lengths = jnp.array([5, 8], dtype=jnp.int32)
    loss = jax.block_until_ready(masked_pose_l1(prediction, target, lengths))
    ref = _reference(prediction, target, lengths)
    assert jnp.allclose(loss, ref, rtol=1e-5, atol=1e-5), (loss, ref)

    # Case 2: batch not a multiple of the tile -> exercises the partial last
    # block and the multi-step "parallel" grid without any wrapper-side pad.
    B2, T2, D2 = 10, 8, 32
    prediction2 = jax.random.normal(k3, (B2, T2, D2), dtype=jnp.float32)
    target2 = jax.random.normal(k4, (B2, T2, D2), dtype=jnp.float32)
    lengths2 = jnp.array([5, 8, 1, 7, 3, 8, 2, 6, 4, 8], dtype=jnp.int32)
    loss2 = jax.block_until_ready(masked_pose_l1(prediction2, target2, lengths2))
    ref2 = _reference(prediction2, target2, lengths2)
    assert jnp.allclose(loss2, ref2, rtol=1e-5, atol=1e-5), (loss2, ref2)

    print("KERNEL_OK")
</pallas_src>

<mosaic_0001>
module attributes {stable_mosaic.version = 11 : i64} {
  func.func @_masked_l1_kernel(%arg0: i32, %arg1: memref<2x256xf32, #tpu.memory_space<vmem>>, %arg2: memref<2x256xf32, #tpu.memory_space<vmem>>, %arg3: memref<2x1xi32, #tpu.memory_space<vmem>>, %arg4: memref<1x8x128xf32, #tpu.memory_space<vmem>>) attributes {dimension_semantics = [#tpu.dimension_semantics<parallel>], iteration_bounds = array<i64: 1>, scalar_prefetch = 0 : i64, scratch_operands = 0 : i64, tpu.core_type = #tpu.core_type<tc>, window_params = [{transform_indices = @transform_0, window_bounds = array<i64: 2, 256>}, {transform_indices = @transform_1, window_bounds = array<i64: 2, 256>}, {transform_indices = @transform_2, window_bounds = array<i64: 2, 1>}, {transform_indices = @transform_3, window_bounds = array<i64: 1, 8, 128>}]} {
    %c0 = arith.constant 0 : index
    %c0_0 = arith.constant 0 : index
    %0 = vector.load %arg1[%c0, %c0_0] : memref<2x256xf32, #tpu.memory_space<vmem>>, vector<2x256xf32>
    %c0_1 = arith.constant 0 : index
    %c0_2 = arith.constant 0 : index
    %1 = vector.load %arg2[%c0_1, %c0_2] : memref<2x256xf32, #tpu.memory_space<vmem>>, vector<2x256xf32>
    %2 = arith.subf %0, %1 : vector<2x256xf32>
    %3 = math.absf %2 : vector<2x256xf32>
    %c0_3 = arith.constant 0 : index
    %c0_4 = arith.constant 0 : index
    %4 = vector.load %arg3[%c0_3, %c0_4] : memref<2x1xi32, #tpu.memory_space<vmem>>, vector<2x1xi32>
    %5 = tpu.iota {dimensions = array<i32: 1>} : vector<2x256xi32>
    %6 = vector.broadcast %4 : vector<2x1xi32> to vector<2x256xi32>
    %7 = arith.cmpi slt, %5, %6 : vector<2x256xi32>
    %cst = arith.constant 0.000000e+00 : f32
    %8 = vector.broadcast %cst : f32 to vector<2x256xf32>
    %9 = arith.select %7, %3, %8 : vector<2x256xi1>, vector<2x256xf32>
    %cst_5 = arith.constant dense<0.000000e+00> : vector<2xf32>
    %10 = vector.multi_reduction <add>, %9, %cst_5 [1] : vector<2x256xf32> to vector<2xf32>
    %11 = vector.shape_cast %10 : vector<2xf32> to vector<2x1xf32>
    %12 = arith.sitofp %4 : vector<2x1xi32> to vector<2x1xf32>
    %13 = arith.divf %11, %12 : vector<2x1xf32>
    %14 = tpu.iota {dimensions = array<i32: 0>} : vector<2x1xi32>
    %c2_i32 = arith.constant 2 : i32
    %15 = arith.muli %arg0, %c2_i32 : i32
    %16 = vector.broadcast %15 : i32 to vector<2x1xi32>
    %17 = arith.addi %16, %14 : vector<2x1xi32>
    %c2_i32_6 = arith.constant 2 : i32
    %18 = vector.broadcast %c2_i32_6 : i32 to vector<2x1xi32>
    %19 = arith.cmpi slt, %17, %18 : vector<2x1xi32>
    %cst_7 = arith.constant 0.000000e+00 : f32
    %20 = vector.broadcast %cst_7 : f32 to vector<2x1xf32>
    %21 = arith.select %19, %13, %20 : vector<2x1xi1>, vector<2x1xf32>
    %22 = vector.shape_cast %21 : vector<2x1xf32> to vector<1x2x1xf32>
    %cst_8 = arith.constant dense<0.000000e+00> : vector<1xf32>
    %23 = vector.multi_reduction <add>, %22, %cst_8 [1, 2] : vector<1x2x1xf32> to vector<1xf32>
    %24 = vector.shape_cast %23 : vector<1xf32> to vector<1x1x1xf32>
    %25 = vector.extract %24[0, 0, 0] : f32 from vector<1x1x1xf32>
    %26 = vector.broadcast %25 : f32 to vector<1x1xf32>
    %27 = vector.shape_cast %26 : vector<1x1xf32> to vector<1x1x1xf32>
    %28 = vector.shape_cast %27 : vector<1x1x1xf32> to vector<1x1x1xf32>
    %29 = vector.broadcast %28 : vector<1x1x1xf32> to vector<1x8x128xf32>
    %c0_9 = arith.constant 0 : index
    %c0_10 = arith.constant 0 : index
    %c0_11 = arith.constant 0 : index
    %30 = vector.load %arg4[%c0_9, %c0_10, %c0_11] : memref<1x8x128xf32, #tpu.memory_space<vmem>>, vector<1x8x128xf32>
    tpu.vector_store %arg4[%c0_9, %c0_10, %c0_11], %29 {strides = array<i32>} : memref<1x8x128xf32, #tpu.memory_space<vmem>>, vector<1x8x128xf32>,
    return
  }
  func.func @transform_0(%arg0: i32) -> (i32, i32) {
    %c0_i32 = arith.constant 0 : i32
    %c0_i32_0 = arith.constant 0 : i32
    return %arg0, %c0_i32 : i32, i32
  }
  func.func @transform_1(%arg0: i32) -> (i32, i32) {
    %c0_i32 = arith.constant 0 : i32
    %c0_i32_0 = arith.constant 0 : i32
    return %arg0, %c0_i32 : i32, i32
  }
  func.func @transform_2(%arg0: i32) -> (i32, i32) {
    %c0_i32 = arith.constant 0 : i32
    %c0_i32_0 = arith.constant 0 : i32
    return %arg0, %c0_i32 : i32, i32
  }
  func.func @transform_3(%arg0: i32) -> (i32, i32, i32) {
    %c0_i32 = arith.constant 0 : i32
    %c0_i32_0 = arith.constant 0 : i32
    %c0_i32_1 = arith.constant 0 : i32
    return %arg0, %c0_i32, %c0_i32_0 : i32, i32, i32
  }
}

</mosaic_0001>

<bundles_post_ra>
// kernel: tpu_custom_call.1
= control target key start
LH: loop header
LB: loop body
LE: loop exit
PB: predicated region body
PF: predicated region fallthrough
CT: control target
= control target key end

     0   :  { %8 = vsyncpa [#allocation3], 0  ;;  %s208_s0 = inlined_call_operand.hbm [shape: f32[2,256], index: 0, kind: input, shape index: {}]   ;;  %s209_s1 = inlined_call_operand.vmem [shape: f32[2,256], index: 1, kind: input, shape index: {}]   ;;  %s210_s2 = inlined_call_operand.vmem [shape: s32[2,1], index: 2, kind: input, shape index: {}]   ;;  %s211_s3 = inlined_call_operand.hbm [shape: f32[1,8,128], index: 3, kind: output, shape index: {}]  }
   0x1   :  { %9 = vsyncpa [#allocation4], 0  ;;  %s154_s12 = smov [#allocation2]   ;;  %s106_s16 = scalar_lea.hbm %s208_s0, 64 }
   0x2   :  { %s16_s13 = sshll.u32 %s154_s12, 4  ;;  %p107_p0 = scmp.ne.s32.totalorder %s208_s0, %s106_s16  ;;  %s17_s13 = int_to_ptr.vmem [resolvable:$true] %s16_s13 }
   0x3   :  { %p110_p1 = scmp.lt.u32.totalorder %s106_s16, %s208_s0 }
   0x5   :  { %p112_p2 = pnand %p110_p1, %p107_p0 }
   0x7   :  { %115 = shalt.err (!%p112_p2)
}
   0x8   :  { %s116_s21 = scalar_lea.vmem %s17_s13, 64  ;;  %p121_p4 = scmp.lt.s32.totalorder %s17_s13, %s17_s13 }
   0x9   :  { %p117_p3 = scmp.ne.s32.totalorder %s17_s13, %s116_s21  ;;  %p122_p5 = scmp.lt.s32.totalorder %s116_s21, %s116_s21 }
   0xb   :  { %p123_p6 = por %p122_p5, %p121_p4 }
   0xd   :  { %p124_p7 = pnand %p123_p6, %p117_p3 }
   0xf   :  { %127 = shalt.err (!%p124_p7)
}
  0x10   :  { %19 = dma.hbm_to_vmem [thread:$0]  %s208_s0, 64, %s17_s13, [#allocation3]  }
  0x11   :  { %150 = dma.done.wait [#allocation3], 64  }
  0x12   :  { %151 = vsyncadd [#allocation3], 4294967232  ;;  %v155_v0 = vmov 0   ;;  %v31_v1 = vld [vmem:[%s210_s2] sm:$0x3]  ;;  %v32_v2 = vlaneseq  ;;  %vm53_vm0 = vcmask 1041408  }
  0x13   :  { %103 = vset.pattern.permute.xlu0 %v155_v0  ;;  %v156_v3 = vmov 1983009808   ;;  %v27_v5 = vld [vmem:[#allocation2] sm:$0xf]  ;;  %v59_v22 = vcvt.s32.f32 %v31_v1  ;;  %vm69_vm4 = vcmask 1024   ;;  %s157_s0 = smov [#allocation5]  }
  0x14   :  { %36 = vperm.xlu0 %103, %v31_v1   ;;  %v42_v4 = vunpack.c.l.s4 %v156_v3  ;;  %v28_v6 = vld [vmem:[%s209_s1] sm:$0xf]  ;;  %v45_v8 = vshrl.u32 %v32_v2, 7  ;;  %v33_v12 = vand.u32 127, %v32_v2  ;;  %s88_s1 = sshll.u32 %s157_s0, 4  ;;  %s89_s1 = int_to_ptr.vmem [resolvable:$true] %s88_s1 }
  0x15   :  { %v29_v9 = vsub.f32 %v27_v5, %v28_v6  ;;  %104 = vrcp.f32 %v59_v22  ;;  %s128_s28 = scalar_lea.vmem %s89_s1, 128  ;;  %p133_p9 = scmp.lt.s32.totalorder %s89_s1, %s89_s1 }
  0x16   :  { %v43_v7 = vunpack.c.0.s8 %v42_v4  ;;  %v34_v14 = vadd.s32 128, %v33_v12  ;;  %vm67_vm3 = vcmp.lt.s32.totalorder %v45_v8, 2  ;;  %p129_p8 = scmp.ne.s32.totalorder %s89_s1, %s128_s28  ;;  %p134_p10 = scmp.lt.s32.totalorder %s128_s28, %s128_s28 }
  0x17   :  { %v30_v11 = vand.u32 2147483647, %v29_v9 }
  0x18   :  { %v46_v10 = vsub.s32 %v43_v7, %v45_v8  ;;  %p135_p11 = por %p134_p10, %p133_p9 }
  0x1a   :  { %v47_v13 = vrot.slane %v30_v11, %v46_v10  ;;  %p136_p12 = pnand %p135_p11, %p129_p8 }
  0x1c   :  { %v48_v15 = vcombine.high %v47_v13, %v47_v13 }
  0x1f   :  { %v105_v23 = vpop.eup %104 }
  0x93   :  { %v37_v16 = vpop.permute.xlu0 %36 }
  0x94   :  { %vm38_vm1 = vcmp.lt.s32.totalorder %v33_v12, %v37_v16  ;;  %vm39_vm2 = vcmp.lt.s32.totalorder %v34_v14, %v37_v16 }
  0x95   :  { %v51_v17 = vsel %vm38_vm1, %v47_v13, 0.0  ;;  %v52_v18 = vsel %vm39_vm2, %v48_v15, 0.0 }
  0x96   :  { %v54_v19 = vsel %vm53_vm0, %v51_v17, 0.0  ;;  %v55_v20 = vsel %vm53_vm0, %v52_v18, 0.0 }
  0x97   :  { %v56_v21 = vadd.f32 %v55_v20, %v54_v19 }
  0x99   :  { %57 = vadd.xlane.f32.xlu0 %v56_v21 }
 0x126   :  { %v58_v24 = vpop.xlane.xlu0 %57 }
 0x127   :  { %v61_v25 = vmul.f32 %v105_v23, %v58_v24 }
 0x129   :  { %v68_v26 = vsel %vm67_vm3, %v61_v25, 0.0 }
 0x12a   :  { %v70_v27 = vsel %vm69_vm4, %v68_v26, 0.0 }
 0x12b   :  { %71 = vadd.xlane.f32.xlu1 %v70_v27 }
 0x1b8   :  { %v72_v28 = vpop.xlane.xlu1 %71 }
 0x1b9   :  { %v73_v29 = vrot.slane %v72_v28, 4 }
 0x1bb   :  { %v74_v30 = vadd.f32 %v73_v29, %v72_v28 }
 0x1bd   :  { %v75_v31 = vrot.slane %v74_v30, 2 }
 0x1bf   :  { %v76_v32 = vadd.f32 %v75_v31, %v74_v30 }
 0x1c1   :  { %v77_v33 = vrot.slane %v76_v32, 1 }
 0x1c3   :  { %v78_v34 = vadd.f32 %v77_v33, %v76_v32 }
 0x1c5   :  { %97 = vpush %v78_v34 }
 0x1f6   :  { %s98_s2 = spop %97 }
 0x1f7   :  { %v80_v35 = vstv %s98_s2 }
 0x1f8   :  { %81 = vst [vmem:[#allocation5] sm:$0xff] %v80_v35 }
 0x1f9   :  { %139 = shalt.err (!%p136_p12)
}
 0x1fa   :  { %s140_s4 = scalar_lea.hbm %s211_s3, 128 }
 0x1fb   :  { %p141_p13 = scmp.ne.s32.totalorder %s211_s3, %s140_s4  ;;  %p144_p0 = scmp.lt.u32.totalorder %s140_s4, %s211_s3 }
 0x1fd   :  { %p146_p1 = pnand %p144_p0, %p141_p13 }
 0x1ff   :  { %149 = shalt.err (!%p146_p1)
}
 0x200   :  { %91 = dma.vmem_to_hbm [thread:$0]  %s89_s1, 128, %s211_s3, [#allocation4]  }
 0x201   :  { %152 = dma.done.wait [#allocation4], 128  }
 0x202   :  { %153 = vsyncadd [#allocation4], 4294967168 }
 0x203   :  { %95 = vsyncpa [#allocation3], 1 }
 0x204   :  { %96 = vsyncpa [#allocation4], 1 }

</bundles_post_ra>
